<compile_context>
chip_gen: v5e
topology: v5e:2x2
jax: 0.10.0
libtpu: 0.0.40
codegen_flags: <defaults>
</compile_context>

<pallas_src>
import jax
import jax.numpy as jnp
import numpy as np
from jax import lax
from jax.experimental import pallas as pl
from jax.experimental.pallas import tpu as pltpu


_LANE = 128
_SUBLANE = 8


def _round_up(x, m):
    return ((x + m - 1) // m) * m


# ----------------------------- Pallas kernel ---------------------------------
def _make_kernel(tile_r, rt, hw, need_mask):
    """Fused conv(matmul)+bias+ReLU -> global-avg-pool (accumulated) -> linear head."""

    def kernel(patches_ref, wc_ref, bc_ref, wl_ref, bl_ref, out_ref, acc_ref):
        r = pl.program_id(1)

        @pl.when(r == 0)
        def _zero():
            acc_ref[...] = jnp.zeros_like(acc_ref)

        # conv-as-matmul on this row tile (MXU): [TILE_R, CKK_P] @ [CKK_P, F_P]
        a = jnp.dot(patches_ref[...], wc_ref[...], preferred_element_type=jnp.float32)
        a = jnp.maximum(a + bc_ref[...], 0.0)                    # bias + ReLU (VPU), lane-dense

        if need_mask:
            # zero padded rows (they would otherwise contribute ReLU(bias) to the pool)
            row = r * tile_r + lax.broadcasted_iota(jnp.int32, (tile_r, 1), 0)
            a = jnp.where(row < hw, a, 0.0)

        # per-image global sum (replaces the old dense [N, N*H*W] pooling matmul)
        acc_ref[...] += jnp.sum(a, axis=0, keepdims=True)        # [1, F_P]

        @pl.when(r == rt - 1)
        def _finalize():
            pooled = acc_ref[...] * (1.0 / hw)                   # mean pool, [1, F_P]
            logits = jnp.dot(pooled, wl_ref[...],
                             preferred_element_type=jnp.float32) + bl_ref[...]
            out_ref[...] = logits.reshape(out_ref.shape).astype(out_ref.dtype)

    return kernel


def _run_model_pallas(patches, wc, bc, wl, bl, n, hw, tile_r, rt, cls_p):
    ckk_p = patches.shape[1]
    f_p = wc.shape[1]
    need_mask = (rt * tile_r != hw)
    kernel = _make_kernel(tile_r, rt, hw, need_mask)

    flops = 2 * n * rt * tile_r * ckk_p * f_p + 2 * n * f_p * cls_p
    bytes_accessed = 4 * (patches.size + wc.size + bc.size + wl.size + bl.size
                          + n * cls_p)

    return pl.pallas_call(
        kernel,
        out_shape=jax.ShapeDtypeStruct((n, 1, cls_p), jnp.float32),
        grid=(n, rt),
        in_specs=[
            # streamed: one row-tile of the im2col patches per step (double-buffered)
            pl.BlockSpec((tile_r, ckk_p), lambda i, r: (i * rt + r, 0)),
            # resident small operands (constant block index)
            pl.BlockSpec((ckk_p, f_p), lambda i, r: (0, 0)),
            pl.BlockSpec((1, f_p), lambda i, r: (0, 0)),
            pl.BlockSpec((f_p, cls_p), lambda i, r: (0, 0)),
            pl.BlockSpec((1, cls_p), lambda i, r: (0, 0)),
        ],
        # output block revisited across the reduction axis r; written in finalize only
        out_specs=pl.BlockSpec((1, 1, cls_p), lambda i, r: (i, 0, 0)),
        scratch_shapes=[pltpu.VMEM((1, f_p), jnp.float32)],
        compiler_params=pltpu.CompilerParams(
            dimension_semantics=("parallel", "arbitrary")),
        cost_estimate=pl.CostEstimate(flops=flops, transcendentals=0,
                                      bytes_accessed=bytes_accessed),
    )(patches, wc, bc, wl, bl)


# ------------------------------ glue (plain JAX) ------------------------------
def _im2col_nchw(x, k=3, pad=1):
    """x: [N, C, H, W] -> patches [N*H*W, C*K*K] with column order (c, kh, kw)."""
    n, c, h, w = x.shape
    xp = jnp.pad(x, ((0, 0), (0, 0), (pad, pad), (pad, pad)))
    cols = []
    for dh in range(k):
        for dw in range(k):
            cols.append(xp[:, :, dh:dh + h, dw:dw + w])          # [N, C, H, W]
    p = jnp.stack(cols, axis=0)                                   # [K*K, N, C, H, W]
    p = jnp.transpose(p, (1, 3, 4, 2, 0))                         # [N, H, W, C, K*K]
    return p.reshape(n * h * w, c * k * k)


class FeatureStractorPallas:
    """Pallas re-implementation of FeatureStractor.forward (== self.model(x))."""

    def __init__(self, in_channels=4, feat_channels=8, num_classes=10, k=3, seed=0):
        key = jax.random.PRNGKey(seed)
        k0, k1, k2, k3 = jax.random.split(key, 4)
        # torch Conv2d weight layout: [Cout, Cin, Kh, Kw]
        self.conv_w = (jax.random.normal(k0, (feat_channels, in_channels, k, k),
                                         jnp.float32) * 0.1)
        self.conv_b = jax.random.normal(k1, (feat_channels,), jnp.float32) * 0.1
        # torch Linear weight layout: [out_features, in_features]
        self.fc_w = jax.random.normal(k2, (num_classes, feat_channels), jnp.float32) * 0.1
        self.fc_b = jax.random.normal(k3, (num_classes,), jnp.float32) * 0.1
        self.k = k
        self.in_channels = in_channels
        self.feat_channels = feat_channels
        self.num_classes = num_classes

        # ---- precompute lane-dense (128-padded), MXU-friendly parameter layouts once ----
        ckk = in_channels * k * k
        self.ckk = ckk
        self.ckk_p = _round_up(ckk, _LANE)
        self.f_p = _round_up(feat_channels, _LANE)
        self.cls_p = _round_up(num_classes, _LANE)

        wc = self.conv_w.reshape(feat_channels, ckk).T            # [CKK, F]
        self.wc_pad = (jnp.zeros((self.ckk_p, self.f_p), jnp.float32)
                       .at[:ckk, :feat_channels].set(wc))
        self.bc_pad = (jnp.zeros((1, self.f_p), jnp.float32)
                       .at[0, :feat_channels].set(self.conv_b))
        wl = self.fc_w.T                                          # [F, classes]
        self.wl_pad = (jnp.zeros((self.f_p, self.cls_p), jnp.float32)
                       .at[:feat_channels, :num_classes].set(wl))
        self.bl_pad = (jnp.zeros((1, self.cls_p), jnp.float32)
                       .at[0, :num_classes].set(self.fc_b))

    def forward(self, x_nchw):
        n, c, h, w = x_nchw.shape
        k = self.k
        hw = h * w

        # row tile: large enough to pipeline / feed the MXU, small enough that the
        # double-buffered patches tiles (~2 * tile_r * 128 * 4B) fit every generation's VMEM.
        tile_r = min(512, _round_up(hw, _SUBLANE))
        rt = pl.cdiv(hw, tile_r)
        hw_pad = rt * tile_r

        patches = _im2col_nchw(x_nchw, k=k, pad=k // 2)           # [N*H*W, CKK]
        p3 = patches.reshape(n, hw, self.ckk)
        p3 = jnp.pad(p3, ((0, 0), (0, hw_pad - hw), (0, self.ckk_p - self.ckk)))
        patches_p = p3.reshape(n * hw_pad, self.ckk_p)            # [N*HW_pad, CKK_P]

        out = _run_model_pallas(patches_p, self.wc_pad, self.bc_pad,
                                self.wl_pad, self.bl_pad,
                                n, hw, tile_r, rt, self.cls_p)
        return out.reshape(n, self.cls_p)[:, :self.num_classes]

    def __call__(self, x):
        return self.forward(x)


# ----------------------------- pure-JAX reference -----------------------------
def _reference_forward(model, x_nchw):
    out = lax.conv_general_dilated(
        x_nchw, model.conv_w, window_strides=(1, 1), padding="SAME",
        dimension_numbers=("NCHW", "OIHW", "NCHW"))
    out = jnp.maximum(out + model.conv_b[None, :, None, None], 0.0)
    pooled = out.mean(axis=(2, 3))                                # [N, F]
    return pooled @ model.fc_w.T + model.fc_b[None, :]


if __name__ == "__main__":
    key = jax.random.PRNGKey(0)
    x = jax.random.normal(key, (2, 4, 16, 16), jnp.float32)       # NCHW, like PyTorch

    model = FeatureStractorPallas(in_channels=4, feat_channels=8, num_classes=10, seed=0)

    logits = model(x)
    logits = jax.block_until_ready(logits)

    ref = _reference_forward(model, x)
    assert logits.shape == (2, 10)
    assert np.allclose(np.asarray(logits), np.asarray(ref), atol=1e-4, rtol=1e-4), \
        "Pallas kernel mismatch vs JAX reference"

    print("KERNEL_OK")
</pallas_src>

<mosaic_0001>
module attributes {stable_mosaic.version = 11 : i64} {
  func.func @kernel(%arg0: i32, %arg1: i32, %arg2: memref<256x128xf32, #tpu.memory_space<vmem>>, %arg3: memref<128x128xf32, #tpu.memory_space<vmem>>, %arg4: memref<1x128xf32, #tpu.memory_space<vmem>>, %arg5: memref<128x128xf32, #tpu.memory_space<vmem>>, %arg6: memref<1x128xf32, #tpu.memory_space<vmem>>, %arg7: memref<1x1x128xf32, #tpu.memory_space<vmem>>, %arg8: memref<1x128xf32, #tpu.memory_space<vmem>>) attributes {dimension_semantics = [#tpu.dimension_semantics<parallel>, #tpu.dimension_semantics<arbitrary>], iteration_bounds = array<i64: 2, 1>, scalar_prefetch = 0 : i64, scratch_operands = 1 : i64, tpu.core_type = #tpu.core_type<tc>, window_params = [{transform_indices = @transform_0, window_bounds = array<i64: 256, 128>}, {pipeline_mode = #tpu.pipeline_mode<synchronous>, transform_indices = @transform_1, window_bounds = array<i64: 128, 128>}, {pipeline_mode = #tpu.pipeline_mode<synchronous>, transform_indices = @transform_2, window_bounds = array<i64: 1, 128>}, {pipeline_mode = #tpu.pipeline_mode<synchronous>, transform_indices = @transform_3, window_bounds = array<i64: 128, 128>}, {pipeline_mode = #tpu.pipeline_mode<synchronous>, transform_indices = @transform_4, window_bounds = array<i64: 1, 128>}, {transform_indices = @transform_5, window_bounds = array<i64: 1, 1, 128>}]} {
    %c0_i32 = arith.constant 0 : i32
    %0 = arith.cmpi eq, %arg1, %c0_i32 : i32
    %1 = arith.extui %0 : i1 to i32
    %c0_i32_0 = arith.constant 0 : i32
    %2 = arith.cmpi ne, %1, %c0_i32_0 : i32
    scf.if %2 {
      %cst_14 = arith.constant 0.000000e+00 : f32
      %19 = vector.broadcast %cst_14 : f32 to vector<1x128xf32>
      %c0_15 = arith.constant 0 : index
      %c0_16 = arith.constant 0 : index
      %20 = vector.load %arg8[%c0_15, %c0_16] : memref<1x128xf32, #tpu.memory_space<vmem>>, vector<1x128xf32>
      tpu.vector_store %arg8[%c0_15, %c0_16], %19 {strides = array<i32>} : memref<1x128xf32, #tpu.memory_space<vmem>>, vector<1x128xf32>,
    } else {
    }
    %c0 = arith.constant 0 : index
    %c0_1 = arith.constant 0 : index
    %3 = vector.load %arg2[%c0, %c0_1] : memref<256x128xf32, #tpu.memory_space<vmem>>, vector<256x128xf32>
    %c0_2 = arith.constant 0 : index
    %c0_3 = arith.constant 0 : index
    %4 = vector.load %arg3[%c0_2, %c0_3] : memref<128x128xf32, #tpu.memory_space<vmem>>, vector<128x128xf32>
    %cst = arith.constant dense<0.000000e+00> : vector<256x128xf32>
    %5 = tpu.matmul %3, %4, %cst {dimension_numbers = #tpu.dot_dimension_numbers<[1], [0], [0], [1], [0, 0, 1, 1], [], []>} : vector<256x128xf32>, vector<128x128xf32>, vector<256x128xf32> -> vector<256x128xf32>
    %c0_4 = arith.constant 0 : index
    %c0_5 = arith.constant 0 : index
    %6 = vector.load %arg4[%c0_4, %c0_5] : memref<1x128xf32, #tpu.memory_space<vmem>>, vector<1x128xf32>
    %7 = vector.broadcast %6 : vector<1x128xf32> to vector<256x128xf32>
    %8 = arith.addf %5, %7 : vector<256x128xf32>
    %cst_6 = arith.constant 0.000000e+00 : f32
    %9 = vector.broadcast %cst_6 : f32 to vector<256x128xf32>
    %10 = arith.maximumf %8, %9 : vector<256x128xf32>
    %c0_7 = arith.constant 0 : index
    %c0_8 = arith.constant 0 : index
    %11 = vector.load %arg8[%c0_7, %c0_8] : memref<1x128xf32, #tpu.memory_space<vmem>>, vector<1x128xf32>
    %cst_9 = arith.constant dense<0.000000e+00> : vector<128xf32>
    %12 = vector.multi_reduction <add>, %10, %cst_9 [0] : vector<256x128xf32> to vector<128xf32>
    %13 = vector.shape_cast %12 : vector<128xf32> to vector<1x128xf32>
    %14 = arith.addf %11, %13 : vector<1x128xf32>
    %c0_10 = arith.constant 0 : index
    %c0_11 = arith.constant 0 : index
    %15 = vector.load %arg8[%c0_10, %c0_11] : memref<1x128xf32, #tpu.memory_space<vmem>>, vector<1x128xf32>
    tpu.vector_store %arg8[%c0_10, %c0_11], %14 {strides = array<i32>} : memref<1x128xf32, #tpu.memory_space<vmem>>, vector<1x128xf32>,
    %c0_i32_12 = arith.constant 0 : i32
    %16 = arith.cmpi eq, %arg1, %c0_i32_12 : i32
    %17 = arith.extui %16 : i1 to i32
    %c0_i32_13 = arith.constant 0 : i32
    %18 = arith.cmpi ne, %17, %c0_i32_13 : i32
    scf.if %18 {
      %c0_14 = arith.constant 0 : index
      %c0_15 = arith.constant 0 : index
      %19 = vector.load %arg8[%c0_14, %c0_15] : memref<1x128xf32, #tpu.memory_space<vmem>>, vector<1x128xf32>
      %cst_16 = arith.constant 3.906250e-03 : f32
      %20 = vector.broadcast %cst_16 : f32 to vector<1x128xf32>
      %21 = arith.mulf %19, %20 : vector<1x128xf32>
      %c0_17 = arith.constant 0 : index
      %c0_18 = arith.constant 0 : index
      %22 = vector.load %arg5[%c0_17, %c0_18] : memref<128x128xf32, #tpu.memory_space<vmem>>, vector<128x128xf32>
      %cst_19 = arith.constant dense<0.000000e+00> : vector<1x128xf32>
      %23 = tpu.matmul %21, %22, %cst_19 {dimension_numbers = #tpu.dot_dimension_numbers<[1], [0], [0], [1], [0, 0, 1, 1], [], []>} : vector<1x128xf32>, vector<128x128xf32>, vector<1x128xf32> -> vector<1x128xf32>
      %c0_20 = arith.constant 0 : index
      %c0_21 = arith.constant 0 : index
      %24 = vector.load %arg6[%c0_20, %c0_21] : memref<1x128xf32, #tpu.memory_space<vmem>>, vector<1x128xf32>
      %25 = arith.addf %23, %24 : vector<1x128xf32>
      %26 = vector.shape_cast %25 : vector<1x128xf32> to vector<1x1x128xf32>
      %c0_22 = arith.constant 0 : index
      %c0_23 = arith.constant 0 : index
      %c0_24 = arith.constant 0 : index
      %27 = vector.load %arg7[%c0_22, %c0_23, %c0_24] : memref<1x1x128xf32, #tpu.memory_space<vmem>>, vector<1x1x128xf32>
      tpu.vector_store %arg7[%c0_22, %c0_23, %c0_24], %26 {strides = array<i32>} : memref<1x1x128xf32, #tpu.memory_space<vmem>>, vector<1x1x128xf32>,
    } else {
    }
    return
  }
  func.func @transform_0(%arg0: i32, %arg1: i32) -> (i32, i32) {
    %c1_i32 = arith.constant 1 : i32
    %0 = arith.muli %arg0, %c1_i32 : i32
    %1 = arith.addi %0, %arg1 : i32
    %c0_i32 = arith.constant 0 : i32
    %c0_i32_0 = arith.constant 0 : i32
    return %1, %c0_i32 : i32, i32
  }
  func.func @transform_1(%arg0: i32, %arg1: i32) -> (i32, i32) {
    %c0_i32 = arith.constant 0 : i32
    %c0_i32_0 = arith.constant 0 : i32
    %c0_i32_1 = arith.constant 0 : i32
    return %c0_i32, %c0_i32_0 : i32, i32
  }
  func.func @transform_2(%arg0: i32, %arg1: i32) -> (i32, i32) {
    %c0_i32 = arith.constant 0 : i32
    %c0_i32_0 = arith.constant 0 : i32
    %c0_i32_1 = arith.constant 0 : i32
    return %c0_i32, %c0_i32_0 : i32, i32
  }
  func.func @transform_3(%arg0: i32, %arg1: i32) -> (i32, i32) {
    %c0_i32 = arith.constant 0 : i32
    %c0_i32_0 = arith.constant 0 : i32
    %c0_i32_1 = arith.constant 0 : i32
    return %c0_i32, %c0_i32_0 : i32, i32
  }
  func.func @transform_4(%arg0: i32, %arg1: i32) -> (i32, i32) {
    %c0_i32 = arith.constant 0 : i32
    %c0_i32_0 = arith.constant 0 : i32
    %c0_i32_1 = arith.constant 0 : i32
    return %c0_i32, %c0_i32_0 : i32, i32
  }
  func.func @transform_5(%arg0: i32, %arg1: i32) -> (i32, i32, i32) {
    %c0_i32 = arith.constant 0 : i32
    %c0_i32_0 = arith.constant 0 : i32
    %c0_i32_1 = arith.constant 0 : i32
    return %arg0, %c0_i32, %c0_i32_0 : i32, i32, i32
  }
}

</mosaic_0001>

<bundles_post_ra>
// kernel: tpu_custom_call.1
= control target key start
LH: loop header
LB: loop body
LE: loop exit
PB: predicated region body
PF: predicated region fallthrough
CT: control target
= control target key end

     0   :  { %s1313_s0 = inlined_call_operand.hbm [shape: f32[512,128], index: 0, kind: input, shape index: {}]   ;;  %s1314_s1 = inlined_call_operand.hbm [shape: f32[128,128], index: 1, kind: input, shape index: {}]   ;;  %s1315_s2 = inlined_call_operand.vmem [shape: f32[1,128], index: 2, kind: input, shape index: {}]   ;;  %s1316_s3 = inlined_call_operand.hbm [shape: f32[128,128], index: 3, kind: input, shape index: {}]   ;;  %s1317_s4 = inlined_call_operand.vmem [shape: f32[1,128], index: 4, kind: input, shape index: {}]   ;;  %s1318_s5 = inlined_call_operand.hbm [shape: f32[2,1,128], index: 5, kind: output, shape index: {}]  }
   0x1   :  { %1321 = sst [smem:[#allocation13_spill]] %s1314_s1 }
   0x2   :  { %1322 = sst [smem:[#allocation14_spill]] %s1316_s3 }
   0x3   :  { %10 = vsyncpa [#allocation4], 0 }
   0x4   :  { %12 = vsyncpa [#allocation4 + $0x1], 0 }
   0x5   :  { %13 = vsyncpa [#allocation7], 0 }
   0x6   :  { %14 = vsyncpa [#allocation5], 0 }
   0x7   :  { %16 = vsyncpa [#allocation5 + $0x1], 0  ;;  %s1050_s18 = smov 0   ;;  %s1052_s19 = smov 0  }
   0x8   :  { %s1054_s20 = smov 0   ;;  %s1056_s21 = smov 0  }
   0x9   :  { %s1058_s22 = smov 0   ;;  %s1060_s23 = smov 0  }
   0xa LB: > { %s686_s24 = sadd.s32 4294967295, %s1013_s23   ;;  %s687_s25 = sadd.s32 4294967294, %s1013_s23   ;;  %s1013_s23 = sphi %s1060_s23, %s22_s23   ;;  %s1009_s22 = sphi %s1058_s22, %s1336_s22   ;;  %s1005_s21 = sphi %s1056_s21, %s1335_s21   ;;  %s1001_s20 = sphi %s1054_s20, %s1334_s20   ;;  %s997_s19 = sphi %s1052_s19, %s1333_s19   ;;  %s993_s18 = sphi %s1050_s18, %s1332_s18  }
   0xb   : > { %p56_p0 = scmp.ne.s32.totalorder %s997_s19, %s993_s18  ;;  %p1086_p1 = scmp.eq.s32.totalorder %s686_s24, 0 }
   0xc   : > { %p170_p2 = scmp.eq.s32.totalorder %s687_s25, 1  ;;  %p688_p4 = scmp.ge.s32.totalorder %s1013_s23, 1 }
   0xd   : > { %p1092_p3 = por %p1086_p1, %p56_p0  ;;  %p177_p6 = scmp.lt.s32.totalorder %s1013_s23, 3 }
   0xe   : > { %p1097_p5 = por %p170_p2, %p56_p0  ;;  %s1326_s1 = sld [smem:[#allocation13_spill]] }
   0xf   : > { %p1105_p7 = pnand %p688_p4, %p177_p6  ;;  %s1015_s8 = smov [#allocation6]  }
  0x10   : > { %s190_s9 = sshll.u32 %s1015_s8, 4  ;;  %p691_p10 = scmp.ge.s32.totalorder %s1013_s23, 2  ;;  %s191_s9 = int_to_ptr.vmem [resolvable:$true] %s190_s9 }
  0x11   : > { %p762_p8 = pneg %p1105_p7  ;;  %s1328_s3 = sld [smem:[#allocation14_spill]] }
  0x12   : > { %s1319_s13 = smov 128   ;;  %s1320_s14 = smov 8  }
  0x13   : > { %p763_p9 = pnand %p762_p8, %p1086_p1  ;;  %s1018_s15 = smov [#allocation8]  }
  0x14   : > { %s188_s6 = sshll.u32 %s1326_s1, 4  ;;  %s207_s16 = sshll.u32 %s1018_s15, 4  ;;  %s189_s6 = int_to_ptr.hbm [resolvable:$true] %s188_s6  ;;  %s208_s16 = int_to_ptr.vmem [resolvable:$true] %s207_s16 }
  0x15   : > { %765 = dma.hbm_to_vmem [thread:$0]  (!%p763_p9), %s189_s6, 2048, %s191_s9, [#allocation7], %s1319_s13, %s1319_s13, %s1320_s14  }
  0x16   : > { %p164_p11 = scmp.eq.s32.totalorder %s686_s24, 1  ;;  %s34_s17 = sadd.s32 1, %s1009_s22 }
  0x17   : > { %s205_s12 = sshll.u32 %s1328_s3, 4  ;;  %p36_p12 = scmp.ge.s32.totalorder %s34_s17, 2  ;;  %s206_s12 = int_to_ptr.hbm [resolvable:$true] %s205_s12 }
  0x18   : > { %768 = dma.hbm_to_vmem [thread:$0]  (!%p763_p9), %s206_s12, 2048, %s208_s16, [#allocation7], %s1319_s13, %s1319_s13, %s1320_s14  }
  0x19   : > { %s43_s25 = sadd.s32 1, %s1001_s20  ;;  %p50_p13 = scmp.ne.s32.totalorder %s1001_s20, %s997_s19 }
  0x1a   : > { %p51_p0 = scmp.eq.s32.totalorder %s1013_s23, 0  ;;  %s1338_s17 = smov (%p36_p12, %s34_s17), 0 }
  0x1b   : > { %p1132_p2 = por %p164_p11, %p50_p13  ;;  %p779_p4 = scmp.lt.s32.totalorder %s1013_s23, 2 }
  0x1c   : > { %s40_s30 = ssub.s32 %s1009_s22, %s1338_s17  ;;  %s224_s6 = sand.u32 1, %s1001_s20  }
  0x1d   : > { %p41_p6 = scmp.eq.s32.totalorder %s40_s30, 0  ;;  %p52_p8 = por %p51_p0, %p50_p13 }
  0x1e   : > { %s692_s8 = sshll.u32 %s224_s6, 8  ;;  %s701_s24 = sshll.u32 %s1009_s22, 8 }
  0x1f   : > { %s1142_s9 = scalar_select %p41_p6, %s1001_s20, %s43_s25  }
  0x20   : > { %s234_s12 = scalar_lea.hbm %s1313_s0, %s701_s24  ;;  %s228_s16 = scalar_lea.vmem [#allocation3], %s692_s8 }
  0x21   : > { %s235_s15 = sshll.u32 %s234_s12, 4  ;;  %s237_s13 = sshll.u32 %s228_s16, 4  ;;  %s236_s15 = int_to_ptr.hbm [resolvable:$true] %s235_s15  ;;  %s238_s13 = int_to_ptr.vmem [resolvable:$true] %s237_s13 }
  0x22   : > { %p770_p9 = pnand %p779_p4, %p52_p8  ;;  %s225_s14 = scalar_lea.sflag [#allocation4], %s224_s6 }
  0x23   : > { %s1330_s1 = smov 8   ;;  %s1331_s3 = smov 128  }
  0x24   : > { %772 = dma.hbm_to_vmem [thread:$0]  (!%p770_p9), %s236_s15, 4096, %s238_s13, %s225_s14, %s1331_s3, %s1331_s3, %s1330_s1  }
  0x25   : > { %249 = sbr.rel (%p1105_p7) target bundleno = 468 (0x1d4), region = 40  ;;  %s1155_s25 = sand.u32 (!%p1105_p7), 1, %s997_s19  }
  0x26   : > { %s696_s30 = sshll.u32 (!%p1105_p7), %s1155_s25, 8  ;;  %s252_s8 = scalar_lea.sflag (!%p1105_p7), [#allocation4], %s1155_s25 }
  0x27   : > { %s1159_s24 = scalar_lea.vmem (!%p1105_p7), [#allocation3], %s696_s30 }
  0x2a   : > { %980 = dma.done.wait (%p1092_p3), %s252_s8, 4096  }
  0x2b   : > { %982 = vsyncadd (%p1092_p3), %s252_s8, 4294963200 }
  0x2c   : > { %984 = dma.done.wait (%p1086_p1), [#allocation7], 4096  }
  0x2d   : > { %986 = vsyncadd (%p1086_p1), [#allocation7], 4294963200  ;;  %v346_v0 = vld [vmem:[#allocation6 + $0x78] sm:$0xff]  ;;  %v345_v1 = vld [vmem:[#allocation6 + $0x70] sm:$0xff]  ;;  %s588_s7 = scalar_lea.hbm %s1318_s5, %s1005_s21  ;;  %s291_s6 = scalar_lea.vmem [#allocation9], %s1155_s25 }
  0x2e   : > { %351 = vmatpush.msra.mxu0 %v346_v0  ;;  %703 = vmatpush.msra.mxu2 %v346_v0  ;;  %v344_v2 = vld [vmem:[#allocation6 + $0x68] sm:$0xff]  ;;  %v343_v3 = vld [vmem:[#allocation6 + $0x60] sm:$0xff]  ;;  %v342_v4 = vld [vmem:[#allocation6 + $0x58] sm:$0xff]  ;;  %s590_s10 = sshll.u32 %s291_s6, 4  ;;  %s592_s11 = sshll.u32 %s588_s7, 4  ;;  %s591_s10 = int_to_ptr.vmem [resolvable:$true] %s590_s10  ;;  %s593_s11 = int_to_ptr.hbm [resolvable:$true] %s592_s11 }
  0x2f   : > { %702 = vmatpush.msra.mxu1 %v346_v0  ;;  %704 = vmatpush.msra.mxu3 %v346_v0  ;;  %v341_v5 = vld [vmem:[#allocation6 + $0x50] sm:$0xff]  ;;  %v340_v6 = vld [vmem:[#allocation6 + $0x48] sm:$0xff]  ;;  %v339_v7 = vld [vmem:[#allocation6 + $0x40] sm:$0xff]  ;;  %s580_s12 = scalar_lea.sflag [#allocation5], %s1155_s25  ;;  %s941_s15 = sshra.s32 %s593_s11, 4  ;;  %s942_s15 = int_to_ptr.hbm [resolvable:$true] %s941_s15 }
  0x30   : > { %352 = vmatpush.msra.mxu0 %v345_v1  ;;  %706 = vmatpush.msra.mxu2 %v345_v1  ;;  %v338_v8 = vld [vmem:[#allocation6 + $0x38] sm:$0xff]  ;;  %v337_v9 = vld [vmem:[#allocation6 + $0x30] sm:$0xff]  ;;  %v336_v10 = vld [vmem:[#allocation6 + $0x28] sm:$0xff]  ;;  %s943_s16 = scalar_lea.hbm %s942_s15, 1  ;;  %s947_s8 = scalar_lea.hbm %s1318_s5, 2 }
  0x31   : > { %705 = vmatpush.msra.mxu1 %v345_v1  ;;  %707 = vmatpush.msra.mxu3 %v345_v1  ;;  %v335_v11 = vld [vmem:[#allocation6 + $0x20] sm:$0xff]  ;;  %v334_v12 = vld [vmem:[#allocation6 + $0x18] sm:$0xff]  ;;  %v333_v13 = vld [vmem:[#allocation6 + $0x10] sm:$0xff]  ;;  %p944_p1 = scmp.ne.s32.totalorder %s942_s15, %s943_s16  ;;  %p948_p11 = scmp.lt.s32.totalorder %s942_s15, %s1318_s5 }
  0x32   : > { %353 = vmatpush.msra.mxu0 %v344_v2  ;;  %709 = vmatpush.msra.mxu2 %v344_v2  ;;  %v332_v14 = vld [vmem:[#allocation6 + $0x8] sm:$0xff]  ;;  %v331_v15 = vld [vmem:[#allocation6] sm:$0xff]  ;;  %v313_v17 = vld [vmem:[%s1159_s24 + $0x70] sm:$0xff]  ;;  %p949_p12 = scmp.lt.s32.totalorder %s947_s8, %s943_s16 }
  0x33   : > { %708 = vmatpush.msra.mxu1 %v344_v2  ;;  %710 = vmatpush.msra.mxu3 %v344_v2  ;;  %v299_v16 = vld [vmem:[%s1159_s24] sm:$0xff]  ;;  %v322_v19 = vld [vmem:[%s1159_s24 + $0xb8] sm:$0xff]  ;;  %v300_v20 = vld [vmem:[%s1159_s24 + $0x8] sm:$0xff]  ;;  %p945_p3 = pnand %p944_p1, %p1132_p2 }
  0x34   : > { %354 = vmatpush.msra.mxu0 %v343_v3  ;;  %712 = vmatpush.msra.mxu2 %v343_v3  ;;  %v307_v18 = vld [vmem:[%s1159_s24 + $0x40] sm:$0xff]  ;;  %v314_v21 = vld [vmem:[%s1159_s24 + $0x78] sm:$0xff]  ;;  %v308_v22 = vld [vmem:[%s1159_s24 + $0x48] sm:$0xff]  ;;  %p950_p13 = por %p949_p12, %p948_p11 }
  0x35   : > { %711 = vmatpush.msra.mxu1 %v343_v3  ;;  %713 = vmatpush.msra.mxu3 %v343_v3  ;;  %v323_v23 = vld [vmem:[%s1159_s24 + $0xc0] sm:$0xff]  ;;  %v301_v24 = vld [vmem:[%s1159_s24 + $0x10] sm:$0xff]  ;;  %v324_v27 = vld [vmem:[%s1159_s24 + $0xc8] sm:$0xff]  ;;  %p946_p7 = pneg %p945_p3 }
  0x36   : > { %355 = vmatpush.msra.mxu0 %v342_v4  ;;  %715 = vmatpush.msra.mxu2 %v342_v4  ;;  %v315_v25 = vld [vmem:[%s1159_s24 + $0x80] sm:$0xff]  ;;  %v309_v26 = vld [vmem:[%s1159_s24 + $0x50] sm:$0xff]  ;;  %v302_v28 = vld [vmem:[%s1159_s24 + $0x18] sm:$0xff] }
  0x37   : > { %714 = vmatpush.msra.mxu1 %v342_v4  ;;  %716 = vmatpush.msra.mxu3 %v342_v4  ;;  %v316_v29 = vld [vmem:[%s1159_s24 + $0x88] sm:$0xff]  ;;  %v310_v30 = vld [vmem:[%s1159_s24 + $0x58] sm:$0xff]  ;;  %v325_v31 = vld [vmem:[%s1159_s24 + $0xd0] sm:$0xff]  ;;  %p951_p0 = pnand %p950_p13, %p946_p7 }
  0x38   : > { %356 = vmatpush.msra.mxu0 %v341_v5  ;;  %718 = vmatpush.msra.mxu2 %v341_v5  ;;  %v303_v32 = vld [vmem:[%s1159_s24 + $0x20] sm:$0xff]  ;;  %v317_v33 = vld [vmem:[%s1159_s24 + $0x90] sm:$0xff]  ;;  %v326_v35 = vld [vmem:[%s1159_s24 + $0xd8] sm:$0xff] }
  0x39   : > { %717 = vmatpush.msra.mxu1 %v341_v5  ;;  %719 = vmatpush.msra.mxu3 %v341_v5  ;;  %v311_v34 = vld [vmem:[%s1159_s24 + $0x60] sm:$0xff]  ;;  %v304_v36 = vld [vmem:[%s1159_s24 + $0x28] sm:$0xff]  ;;  %v318_v37 = vld [vmem:[%s1159_s24 + $0x98] sm:$0xff] }
  0x3a   : > { %357 = vmatpush.msra.mxu0 %v340_v6  ;;  %721 = vmatpush.msra.mxu2 %v340_v6  ;;  %v312_v38 = vld [vmem:[%s1159_s24 + $0x68] sm:$0xff]  ;;  %v327_v39 = vld [vmem:[%s1159_s24 + $0xe0] sm:$0xff]  ;;  %v305_v40 = vld [vmem:[%s1159_s24 + $0x30] sm:$0xff] }
  0x3b   : > { %720 = vmatpush.msra.mxu1 %v340_v6  ;;  %722 = vmatpush.msra.mxu3 %v340_v6  ;;  %v319_v41 = vld [vmem:[%s1159_s24 + $0xa0] sm:$0xff]  ;;  %v328_v42 = vld [vmem:[%s1159_s24 + $0xe8] sm:$0xff]  ;;  %v306_v43 = vld [vmem:[%s1159_s24 + $0x38] sm:$0xff] }
  0x3c   : > { %358 = vmatpush.msra.mxu0 %v339_v7  ;;  %724 = vmatpush.msra.mxu2 %v339_v7  ;;  %v320_v44 = vld [vmem:[%s1159_s24 + $0xa8] sm:$0xff]  ;;  %v329_v45 = vld [vmem:[%s1159_s24 + $0xf0] sm:$0xff]  ;;  %v330_v47 = vld [vmem:[%s1159_s24 + $0xf8] sm:$0xff] }
  0x3d   : > { %723 = vmatpush.msra.mxu1 %v339_v7  ;;  %725 = vmatpush.msra.mxu3 %v339_v7  ;;  %v321_v46 = vld [vmem:[%s1159_s24 + $0xb0] sm:$0xff]  ;;  %v1218_v63 = vld [vmem:[%s1315_s2] ss:$0 sm:$0xff] }
  0x3e   : > { %359 = vmatpush.msra.mxu0 %v338_v8  ;;  %727 = vmatpush.msra.mxu2 %v338_v8 }
  0x3f   : > { %726 = vmatpush.msra.mxu1 %v338_v8  ;;  %728 = vmatpush.msra.mxu3 %v338_v8 }
  0x40   : > { %360 = vmatpush.msra.mxu0 %v337_v9  ;;  %730 = vmatpush.msra.mxu2 %v337_v9 }
  0x41   : > { %729 = vmatpush.msra.mxu1 %v337_v9  ;;  %731 = vmatpush.msra.mxu3 %v337_v9 }
  0x42   : > { %361 = vmatpush.msra.mxu0 %v336_v10  ;;  %733 = vmatpush.msra.mxu2 %v336_v10 }
  0x43   : > { %732 = vmatpush.msra.mxu1 %v336_v10  ;;  %734 = vmatpush.msra.mxu3 %v336_v10 }
  0x44   : > { %362 = vmatpush.msra.mxu0 %v335_v11  ;;  %736 = vmatpush.msra.mxu2 %v335_v11 }
  0x45   : > { %735 = vmatpush.msra.mxu1 %v335_v11  ;;  %737 = vmatpush.msra.mxu3 %v335_v11 }
  0x46   : > { %363 = vmatpush.msra.mxu0 %v334_v12  ;;  %739 = vmatpush.msra.mxu2 %v334_v12 }
  0x47   : > { %738 = vmatpush.msra.mxu1 %v334_v12  ;;  %740 = vmatpush.msra.mxu3 %v334_v12 }
  0x48   : > { %364 = vmatpush.msra.mxu0 %v333_v13  ;;  %742 = vmatpush.msra.mxu2 %v333_v13 }
  0x49   : > { %741 = vmatpush.msra.mxu1 %v333_v13  ;;  %743 = vmatpush.msra.mxu3 %v333_v13 }
  0x4a   : > { %365 = vmatpush.msra.mxu0 %v332_v14  ;;  %745 = vmatpush.msra.mxu2 %v332_v14 }
  0x4b   : > { %744 = vmatpush.msra.mxu1 %v332_v14  ;;  %746 = vmatpush.msra.mxu3 %v332_v14 }
  0x4c   : > { %366 = vmatpush.msra.mxu0 %v331_v15  ;;  %748 = vmatpush.msra.mxu2 %v331_v15 }
  0x4d   : > { %367 = vmatmul.f32.vlgmr.msra.gmra.mxu0 %v299_v16  ;;  %409 = vmatmul.f32.vlgmr.msra.gmra.mxu2 %v313_v17 }
  0x4e   : > { %747 = vmatpush.msra.mxu1 %v331_v15  ;;  %749 = vmatpush.msra.mxu3 %v331_v15 }
  0x4f   : > { %391 = vmatmul.f32.vlgmr.msra.gmra.mxu1 %v307_v18  ;;  %436 = vmatmul.f32.vlgmr.msra.gmra.mxu3 %v322_v19 }
  0x55   : > { %370 = vmatmul.f32.gmra.mxu0 %v300_v20  ;;  %412 = vmatmul.f32.gmra.mxu2 %v314_v21 }
  0x57   : > { %394 = vmatmul.f32.gmra.mxu1 %v308_v22  ;;  %439 = vmatmul.f32.gmra.mxu3 %v323_v23 }
  0x5d   : > { %373 = vmatmul.f32.gmra.mxu0 %v301_v24  ;;  %415 = vmatmul.f32.gmra.mxu2 %v315_v25 }
  0x5f   : > { %397 = vmatmul.f32.gmra.mxu1 %v309_v26  ;;  %442 = vmatmul.f32.gmra.mxu3 %v324_v27 }
  0x65   : > { %376 = vmatmul.f32.gmra.mxu0 %v302_v28  ;;  %418 = vmatmul.f32.gmra.mxu2 %v316_v29 }
  0x67   : > { %400 = vmatmul.f32.gmra.mxu1 %v310_v30  ;;  %445 = vmatmul.f32.gmra.mxu3 %v325_v31 }
  0x6d   : > { %379 = vmatmul.f32.gmra.mxu0 %v303_v32  ;;  %421 = vmatmul.f32.gmra.mxu2 %v317_v33 }
  0x6f   : > { %403 = vmatmul.f32.gmra.mxu1 %v311_v34  ;;  %448 = vmatmul.f32.gmra.mxu3 %v326_v35 }
  0x75   : > { %382 = vmatmul.f32.gmra.mxu0 %v304_v36  ;;  %424 = vmatmul.f32.gmra.mxu2 %v318_v37 }
  0x77   : > { %406 = vmatmul.f32.gmra.mxu1 %v312_v38  ;;  %451 = vmatmul.f32.gmra.mxu3 %v327_v39 }
  0x7d   : > { %385 = vmatmul.f32.gmra.mxu0 %v305_v40  ;;  %427 = vmatmul.f32.gmra.mxu2 %v319_v41 }
  0x7f   : > { %454 = vmatmul.f32.gmra.mxu3 %v328_v42 }
  0x85   : > { %388 = vmatmul.f32.gmra.mxu0 %v306_v43  ;;  %430 = vmatmul.f32.gmra.mxu2 %v320_v44 }
  0x87   : > { %457 = vmatmul.f32.gmra.mxu3 %v329_v45  ;;  %v556_v45 = vld [vmem:[#allocation8 + $0x78] sm:$0xff] }
  0x88   : > { %558 = vmatpush.msrb.mxu1 %v556_v45  ;;  %v544_v45 = vld [vmem:[#allocation8 + $0x18] sm:$0xff] }
  0x8d   : > { %433 = vmatmul.f32.gmra.mxu2 %v321_v46 }
  0x8f   : > { %460 = vmatmul.f32.gmra.mxu3 %v330_v47 }
  0xca   : > { %v368_v48 = vpop.f32.mrf.mxu0 }
  0xcb   : > { %v369_v4 = vadd.f32 %v1218_v63, %v368_v48 }
  0xcc   : > { %v392_v51 = vpop.f32.mrf.mxu1 }
  0xcd   : > { %v464_v8 = vmax.f32 %v369_v4, 0.0  ;;  %v393_v26 = vadd.f32 %v1218_v63, %v392_v51  ;;  %v555_v4 = vld [vmem:[#allocation8 + $0x70] sm:$0xff] }
  0xce   : > { %559 = vmatpush.msrb.mxu1 %v555_v4 }
  0xcf   : > { %v472_v34 = vmax.f32 %v393_v26, 0.0 }
  0xd0   : > { %v1201_v49 = vpop.f32.mrf.mxu2 }
  0xd2   : > { %v371_v50 = vpop.f32.mrf.mxu0  ;;  %v1205_v54 = vpop.f32.mrf.mxu3 }
  0xd3   : > { %v372_v2 = vadd.f32 %v1218_v63, %v371_v50  ;;  %v411_v50 = vadd.f32 %v1218_v63, %v1201_v49 }
  0xd4   : > { %v395_v55 = vpop.f32.mrf.mxu1 }
  0xd5   : > { %v465_v6 = vmax.f32 %v372_v2, 0.0  ;;  %v396_v30 = vadd.f32 %v1218_v63, %v395_v55 }
  0xd7   : > { %v497_v13 = vadd.f32 %v465_v6, %v464_v8  ;;  %v473_v38 = vmax.f32 %v396_v30, 0.0  ;;  %v553_v8 = vld [vmem:[#allocation8 + $0x60] sm:$0xff] }
  0xd8   : > { %v1203_v52 = vpop.f32.mrf.mxu2 }
  0xda   : > { %v374_v53 = vpop.f32.mrf.mxu0  ;;  %v1209_v58 = vpop.f32.mrf.mxu3 }
  0xdb   : > { %v375_v5 = vadd.f32 %v1218_v63, %v374_v53 }
  0xdc   : > { %v398_v61 = vpop.f32.mrf.mxu1 }
  0xdd   : > { %v466_v9 = vmax.f32 %v375_v5, 0.0  ;;  %v399_v35 = vadd.f32 %v1218_v63, %v398_v61  ;;  %v554_v5 = vld [vmem:[#allocation8 + $0x68] sm:$0xff] }
  0xde   : > { %560 = vmatpush.msrb.mxu1 %v554_v5 }
  0xdf   : > { %v498_v17 = vadd.f32 %v497_v13, %v466_v9  ;;  %v474_v41 = vmax.f32 %v399_v35, 0.0  ;;  %v1019_v9 = vmov 0.0   ;;  %v552_v13 = vld [vmem:[#allocation8 + $0x58] sm:$0xff]  ;;  %v441_v35 = vadd.f32 %v1218_v63, %v1209_v58 }
  0xe0   : > { %v1207_v56 = vpop.f32.mrf.mxu2  ;;  %298 = vst [vmem:[#allocation2] sm:$0x1] %v1019_v9  ;;  %561 = vmatpush.msrb.mxu1 %v553_v8 }
  0xe1   : > { %v417_v2 = vadd.f32 %v1218_v63, %v1207_v56 }
  0xe2   : > { %v377_v57 = vpop.f32.mrf.mxu0  ;;  %v1213_v62 = vpop.f32.mrf.mxu3  ;;  %562 = vmatpush.msrb.mxu1 %v552_v13 }
  0xe3   : > { %v378_v7 = vadd.f32 %v1218_v63, %v377_v57 }
  0xe4   : > { %v401_v3 = vpop.f32.mrf.mxu1 }
  0xe5   : > { %v467_v14 = vmax.f32 %v378_v7, 0.0  ;;  %v402_v39 = vadd.f32 %v1218_v63, %v401_v3 }
  0xe7   : > { %v499_v21 = vadd.f32 %v498_v17, %v467_v14  ;;  %v475_v46 = vmax.f32 %v402_v39, 0.0  ;;  %v444_v39 = vadd.f32 %v1218_v63, %v1213_v62 }
  0xe8   : > { %v1211_v59 = vpop.f32.mrf.mxu2 }
  0xe9   : > { %v420_v49 = vadd.f32 %v1218_v63, %v1211_v59 }
  0xea   : > { %v380_v60 = vpop.f32.mrf.mxu0  ;;  %v1227_v12 = vpop.f32.mrf.mxu3 }
  0xeb   : > { %v381_v10 = vadd.f32 %v1218_v63, %v380_v60  ;;  %v414_v60 = vadd.f32 %v1218_v63, %v1203_v52  ;;  %v481_v14 = vmax.f32 %v420_v49, 0.0 }
  0xec   : > { %v404_v20 = vpop.f32.mrf.mxu1 }
  0xed   : > { %v468_v18 = vmax.f32 %v381_v10, 0.0  ;;  %v405_v43 = vadd.f32 %v1218_v63, %v404_v20  ;;  %v479_v6 = vmax.f32 %v414_v60, 0.0  ;;  %v480_v10 = vmax.f32 %v417_v2, 0.0 }
  0xef   : > { %v500_v23 = vadd.f32 %v499_v21, %v468_v18  ;;  %v476_v51 = vmax.f32 %v405_v43, 0.0  ;;  %v551_v18 = vld [vmem:[#allocation8 + $0x50] sm:$0xff] }
  0xf0   : > { %v1220_v1 = vpop.f32.mrf.mxu2  ;;  %563 = vmatpush.msrb.mxu1 %v551_v18 }
  0xf1   : > { %v423_v52 = vadd.f32 %v1218_v63, %v1220_v1 }
  0xf2   : > { %v383_v0 = vpop.f32.mrf.mxu0  ;;  %v1233_v29 = vpop.f32.mrf.mxu3 }
  0xf3   : > { %v384_v15 = vadd.f32 %v1218_v63, %v383_v0  ;;  %v478_v0 = vmax.f32 %v411_v50, 0.0  ;;  %v482_v59 = vmax.f32 %v423_v52, 0.0  ;;  %v450_v58 = vadd.f32 %v1218_v63, %v1233_v29  ;;  %v543_v50 = vld [vmem:[#allocation8 + $0x10] sm:$0xff] }
  0xf4   : > { %v407_v37 = vpop.f32.mrf.mxu1 }
  0xf5   : > { %v469_v22 = vmax.f32 %v384_v15, 0.0  ;;  %v408_v44 = vadd.f32 %v1218_v63, %v407_v37  ;;  %v547_v37 = vld [vmem:[#allocation8 + $0x30] sm:$0xff] }
  0xf7   : > { %v501_v27 = vadd.f32 %v500_v23, %v469_v22  ;;  %v477_v55 = vmax.f32 %v408_v44, 0.0  ;;  %v545_v44 = vld [vmem:[#allocation8 + $0x20] sm:$0xff] }
  0xf8   : > { %v425_v16 = vpop.f32.mrf.mxu2 }
  0xf9   : > { %v426_v15 = vadd.f32 %v1218_v63, %v425_v16  ;;  %v549_v16 = vld [vmem:[#allocation8 + $0x40] sm:$0xff] }
  0xfa   : > { %v386_v11 = vpop.f32.mrf.mxu0  ;;  %v1240_v48 = vpop.f32.mrf.mxu3 }
  0xfb   : > { %v387_v19 = vadd.f32 %v1218_v63, %v386_v11  ;;  %v483_v22 = vmax.f32 %v426_v15, 0.0  ;;  %v453_v62 = vadd.f32 %v1218_v63, %v1240_v48 }
  0xfd   : > { %v470_v24 = vmax.f32 %v387_v19, 0.0  ;;  %v492_v2 = vmax.f32 %v453_v62, 0.0 }
  0xff   : > { %v502_v31 = vadd.f32 %v501_v27, %v470_v24 }
 0x100   : > { %v428_v33 = vpop.f32.mrf.mxu2 }
 0x101   : > { %v429_v20 = vadd.f32 %v1218_v63, %v428_v33  ;;  %v548_v33 = vld [vmem:[#allocation8 + $0x38] sm:$0xff] }
 0x102   : > { %v389_v25 = vpop.f32.mrf.mxu0  ;;  %v455_v56 = vpop.f32.mrf.mxu3 }
 0x103   : > { %v390_v28 = vadd.f32 %v1218_v63, %v389_v25  ;;  %v550_v25 = vld [vmem:[#allocation8 + $0x48] sm:$0xff]  ;;  %v484_v26 = vmax.f32 %v429_v20, 0.0  ;;  %v456_v60 = vadd.f32 %v1218_v63, %v455_v56 }
 0x104   : > { %564 = vmatpush.msrb.mxu1 %v550_v25 }
 0x105   : > { %v471_v32 = vmax.f32 %v390_v28, 0.0  ;;  %v438_v28 = vadd.f32 %v1218_v63, %v1205_v54  ;;  %v488_v54 = vmax.f32 %v441_v35, 0.0  ;;  %v493_v5 = vmax.f32 %v456_v60, 0.0 }
 0x106   : > { %565 = vmatpush.msrb.mxu1 %v549_v16 }
 0x107   : > { %v503_v36 = vadd.f32 %v502_v31, %v471_v32 }
 0x108   : > { %v431_v57 = vpop.f32.mrf.mxu2  ;;  %566 = vmatpush.msrb.mxu1 %v548_v33 }
 0x109   : > { %v504_v40 = vadd.f32 %v503_v36, %v472_v34  ;;  %v432_v1 = vadd.f32 %v1218_v63, %v431_v57 }
 0x10a   : > { %v458_v34 = vpop.f32.mrf.mxu3  ;;  %567 = vmatpush.msrb.mxu1 %v547_v37 }
 0x10b   : > { %v505_v42 = vadd.f32 %v504_v40, %v473_v38  ;;  %v485_v31 = vmax.f32 %v432_v1, 0.0  ;;  %v487_v38 = vmax.f32 %v438_v28, 0.0  ;;  %v459_v29 = vadd.f32 %v1218_v63, %v458_v34 }
 0x10d   : > { %v506_v47 = vadd.f32 %v505_v42, %v474_v41  ;;  %v546_v41 = vld [vmem:[#allocation8 + $0x28] sm:$0xff]  ;;  %v447_v42 = vadd.f32 %v1218_v63, %v1227_v12  ;;  %v491_v12 = vmax.f32 %v450_v58, 0.0  ;;  %v494_v49 = vmax.f32 %v459_v29, 0.0 }
 0x10e   : > { %568 = vmatpush.msrb.mxu1 %v546_v41 }
 0x10f   : > { %v507_v53 = vadd.f32 %v506_v47, %v475_v46  ;;  %v489_v46 = vmax.f32 %v444_v39, 0.0 }
 0x110   : > { %v434_v19 = vpop.f32.mrf.mxu2  ;;  %569 = vmatpush.msrb.mxu1 %v545_v44 }
 0x111   : > { %v508_v61 = vadd.f32 %v507_v53, %v476_v51  ;;  %v435_v24 = vadd.f32 %v1218_v63, %v434_v19  ;;  %v490_v51 = vmax.f32 %v447_v42, 0.0  ;;  %v557_v19 = vld [vmem:[%s1317_s4] sm:$0x1] }
 0x112   : > { %570 = vmatpush.msrb.mxu1 %v544_v45  ;;  %v461_v57 = vpop.f32.mrf.mxu3 }
 0x113   : > { %v509_v3 = vadd.f32 %v508_v61, %v477_v55  ;;  %v486_v32 = vmax.f32 %v435_v24, 0.0  ;;  %v542_v55 = vld [vmem:[#allocation8 + $0x8] sm:$0xff]  ;;  %v462_v4 = vadd.f32 %v1218_v63, %v461_v57 }
 0x114   : > { %571 = vmatpush.msrb.mxu1 %v543_v50 }
 0x115   : > { %v510_v7 = vadd.f32 %v509_v3, %v478_v0  ;;  %v541_v0 = vld [vmem:[#allocation8] sm:$0xff] }
 0x116   : > { %572 = vmatpush.msrb.mxu1 %v542_v55 }
 0x117   : > { %v511_v11 = vadd.f32 %v510_v7, %v479_v6  ;;  %v495_v7 = vmax.f32 %v462_v4, 0.0 }
 0x118   : > { %573 = vmatpush.msrb.mxu1 %v541_v0 }
 0x119   : > { %v512_v17 = vadd.f32 %v511_v11, %v480_v10 }
 0x11b   : > { %v513_v21 = vadd.f32 %v512_v17, %v481_v14  ;;  %v496_v14 = vld [vmem:[#allocation2] sm:$0x1] }
 0x11d   : > { %v514_v23 = vadd.f32 %v513_v21, %v482_v59 }
 0x11f   : > { %v515_v27 = vadd.f32 %v514_v23, %v483_v22 }
 0x121   : > { %v516_v30 = vadd.f32 %v515_v27, %v484_v26 }
 0x123   : > { %v517_v36 = vadd.f32 %v516_v30, %v485_v31 }
 0x125   : > { %v518_v40 = vadd.f32 %v517_v36, %v486_v32 }
 0x127   : > { %v519_v43 = vadd.f32 %v518_v40, %v487_v38 }
 0x129   : > { %v520_v47 = vadd.f32 %v519_v43, %v488_v54 }
 0x12b   : > { %v521_v53 = vadd.f32 %v520_v47, %v489_v46 }
 0x12d   : > { %v522_v61 = vadd.f32 %v521_v53, %v490_v51 }
 0x12f   : > { %v523_v3 = vadd.f32 %v522_v61, %v491_v12 }
 0x131   : > { %v524_v6 = vadd.f32 %v523_v3, %v492_v2 }
 0x133   : > { %v525_v48 = vadd.f32 %v524_v6, %v493_v5 }
 0x135   : > { %v526_v8 = vadd.f32 %v525_v48, %v494_v49 }
 0x137   : > { %v527_v9 = vadd.f32 %v526_v8, %v495_v7 }
 0x139   : > { %v528_v10 = vrot.slane %v527_v9, 4 }
 0x13b   : > { %v529_v52 = vadd.f32 %v528_v10, %v527_v9 }
 0x13d   : > { %v530_v11 = vrot.slane %v529_v52, 2 }
 0x13f   : > { %v531_v13 = vadd.f32 %v530_v11, %v529_v52 }
 0x141   : > { %v532_v56 = vrot.slane %v531_v13, 1 }
 0x143   : > { %v533_v15 = vadd.f32 %v532_v56, %v531_v13 }
 0x145   : > { %v534_v17 = vadd.f32 %v533_v15, %v496_v14 }
 0x147   : > { %535 = vst [vmem:[#allocation2] sm:$0x1] %v534_v17 }
 0x14e   : > { %v539_v63 = vld [vmem:[#allocation2] sm:$0x1] }
 0x14f   : > { %v540_v18 = vmul.f32 0.00390625, %v539_v63 }
 0x151   : > { %574 = vmatmul.f32.vlgmr.msrb.gmra.mxu1 %v540_v18 }
 0x1ce   : > { %v575_v59 = vpop.f32.mrf.mxu1 }
 0x1cf   : > { %v576_v20 = vadd.f32 %v575_v59, %v557_v19 }
 0x1d1   : > { %578 = vst [vmem:[%s291_s6] sm:$0x1] %v576_v20 }
 0x1d2   : > { %954 = shalt.err (!%p951_p0)
}
 0x1d3   : > { %760 = dma.vmem_to_hbm [thread:$0]  (%p1132_p2), %s591_s10, 16, %s593_s11, %s580_s12  }
 0x1d4 PF: > { %s604_s25 = sand.u32 1, %s993_s18   ;;  %p774_p4 = pnand %p691_p10, %p1097_p5 }
 0x1d5   : > { %s605_s3 = scalar_lea.sflag [#allocation5], %s604_s25 }
 0x1d6   : > { %p775_p6 = pneg %p774_p4 }
 0x1d8   : > { %988 = dma.done.wait (%p775_p6), %s605_s3, 16  }
 0x1d9   : > { %990 = vsyncadd (%p775_p6), %s605_s3, 4294967280  ;;  %s22_s23 = sadd.s32 1, %s1013_s23   ;;  %s1332_s18 = smov %s997_s19 }
 0x1da   : > { %p19_p8 = scmp.ge.s32.totalorder %s22_s23, 4   ;;  %s1333_s19 = smov %s1001_s20 }
 0x1db   : > { %s1334_s20 = smov %s1142_s9  ;;  %s1335_s21 = smov %s1009_s22 }
 0x1dc   : > { %s1336_s22 = smov %s1338_s17  ;;  %21 = sbr.rel (!%p19_p8) target bundleno = 10 (0xa), region = 101 }
 0x1e1   :  { %610 = vsyncpa [#allocation4], 1 }
 0x1e2   :  { %612 = vsyncpa [#allocation4 + $0x1], 1 }
 0x1e3   :  { %613 = vsyncpa [#allocation7], 1 }
 0x1e4   :  { %614 = vsyncpa [#allocation5], 1 }
 0x1e5   :  { %616 = vsyncpa [#allocation5 + $0x1], 1 }

</bundles_post_ra>
